<compile_context>
chip_gen: v7x
topology: tpu7x:2x2x1
jax: 0.10.0
libtpu: 0.0.40
codegen_flags: <defaults>
</compile_context>

<pallas_src>
import jax
import jax.numpy as jnp
from jax.experimental import pallas as pl
from jax.experimental.pallas import tpu as pltpu


def gs_kernel(w_ref, x_ref, wt_ref, b_ref, out_ref):
    # w_ref:  (BB, 1, Np)  f32  raw attention logits
    # x_ref:  (BB, C, Np)  bf16 features, channel-major (lane dim = N)
    # wt_ref: (C, C)       f32  folded conv+BN weight (C_out, C_in)
    # b_ref:  (C, 1)       f32  folded conv+BN bias
    # out_ref:(BB, C, Np)  bf16
    BB = x_ref.shape[0]

    # --- degree math for A = wa·waᵀ + I without building A (all f32, O(N)) ---
    wa = jnp.maximum(jnp.tanh(w_ref[...]), 0.0)            # (BB, 1, Np) relu(tanh(w))
    S = jnp.sum(wa, axis=-1, keepdims=True)                 # (BB, 1, 1)
    d = wa * S + 1.0                                        # (BB, 1, Np) degree
    d_isqrt = jax.lax.rsqrt(d)                              # d^{-1/2}
    d_inv = d_isqrt * d_isqrt                               # d^{-1}
    u = wa * d_isqrt                                        # wa ⊙ d^{-1/2}

    X = x_ref[...].astype(jnp.float32)                      # (BB, C, Np)
    Xd = (X * d_inv).astype(jnp.bfloat16)                   # (BB, C, Np) MXU operand
    s = jnp.sum(X * u, axis=-1, keepdims=True)              # (BB, C, 1)  = X @ u

    wt_f32 = wt_ref[...]
    wt_bf16 = wt_f32.astype(jnp.bfloat16)
    b = b_ref[...]

    # (L X)[:, i] = u_i (X u) + d^{-1}_i X[:, i]; fold the rank-1 term into the
    # matmul epilogue:  y = wt @ (X*d_inv) + (wt @ s) * u + b
    for bb in range(BB):                                    # BB is small & static
        y = jnp.dot(wt_bf16, Xd[bb], preferred_element_type=jnp.float32)   # (C, Np)
        rank1 = jnp.dot(wt_f32, s[bb], preferred_element_type=jnp.float32)  # (C, 1)
        y = y + rank1 * u[bb] + b                            # (C, Np)
        y = jnp.maximum(y, 0.0)                              # ReLU
        out_ref[bb] = (X[bb] + y).astype(out_ref.dtype)      # residual add


def _pick_batch_block(B, max_bb=4):
    """Largest divisor of B <= max_bb that still leaves >= 2 grid steps (megacore)."""
    divisors = [bb for bb in range(1, min(max_bb, B) + 1) if B % bb == 0]
    two_steps = [bb for bb in divisors if B // bb >= 2]
    return max(two_steps) if two_steps else max(divisors)


def gs_forward(x, w, conv_w, conv_b, bn_gamma, bn_beta, bn_mean, bn_var,
               eps=1e-5, max_batch_block=4):
    """x: (B, C, N, 1) float32, w: (B, N) float32. Returns (B, C, N, 1) float32."""
    B, C, N, _ = x.shape
    Np = pl.cdiv(N, 128) * 128
    pad = Np - N

    # --- glue: layout (no transposes), N padding, dtype, conv/BN folding ---
    x_cn = x[..., 0]                                          # (B, C, N)
    if pad:
        x_cn = jnp.pad(x_cn, ((0, 0), (0, 0), (0, pad)))      # zero cols (sliced off)
        w_p = jnp.pad(w, ((0, 0), (0, pad)))                  # zeros → relu(tanh)=0, d=1
    else:
        w_p = w
    x_bf = x_cn.astype(jnp.bfloat16)                          # stream bf16 (½ HBM bytes)
    w_row = w_p[:, None, :]                                   # (B, 1, Np) f32 (tiny)

    scale = bn_gamma / jnp.sqrt(bn_var + eps)                 # (C,)
    w_eff = conv_w[:, :, 0, 0] * scale[:, None]               # (C_out, C_in)
    b_eff = ((conv_b - bn_mean) * scale + bn_beta)[:, None]   # (C, 1)

    BB = _pick_batch_block(B, max_batch_block)
    grid = (B // BB,)

    out_bf = pl.pallas_call(
        gs_kernel,
        out_shape=jax.ShapeDtypeStruct((B, C, Np), jnp.bfloat16),
        grid_spec=pltpu.PrefetchScalarGridSpec(
            num_scalar_prefetch=0,
            grid=grid,
            in_specs=[
                pl.BlockSpec((BB, 1, Np), lambda b: (b, 0, 0)),
                pl.BlockSpec((BB, C, Np), lambda b: (b, 0, 0)),
                pl.BlockSpec((C, C), lambda b: (0, 0)),        # resident, no re-DMA
                pl.BlockSpec((C, 1), lambda b: (0, 0)),        # resident, no re-DMA
            ],
            out_specs=pl.BlockSpec((BB, C, Np), lambda b: (b, 0, 0)),
        ),
        compiler_params=pltpu.CompilerParams(
            dimension_semantics=("parallel",)),
    )(w_row, x_bf, w_eff, b_eff)

    out = out_bf[:, :, :N].astype(jnp.float32)                # strip pad, back to f32
    return out[..., None]                                     # (B, C, N, 1)


def gs_reference(x, w, conv_w, conv_b, bn_gamma, bn_beta, bn_mean, bn_var, eps=1e-5):
    """Plain-JAX f32 reference mirroring the PyTorch GS.forward (BN in eval mode)."""
    B, C, N, _ = x.shape
    wa = jnp.maximum(jnp.tanh(w), 0.0)                        # (B, N)
    A = wa[:, :, None] * wa[:, None, :]                       # (B, N, N)
    A = A + jnp.eye(N)[None]
    D = (1.0 / jnp.sum(A, axis=-1)) ** 0.5                    # (B, N)
    L = D[:, :, None] * A * D[:, None, :]
    xT = jnp.transpose(x[..., 0], (0, 2, 1))                  # (B, N, C)
    agg = jnp.matmul(L, xT)                                   # (B, N, C)
    y = jnp.einsum("bnc,oc->bno", agg, conv_w[:, :, 0, 0]) + conv_b[None, None, :]
    y = (y - bn_mean) / jnp.sqrt(bn_var + eps) * bn_gamma + bn_beta
    y = jnp.maximum(y, 0.0)
    out = xT + y
    return jnp.transpose(out, (0, 2, 1))[..., None]


if __name__ == "__main__":
    B, C, N = 2, 32, 200          # N not a multiple of 128 → exercises padding path
    key = jax.random.PRNGKey(0)
    kx, kw, kcw, kcb, kg, kb, km, kv = jax.random.split(key, 8)

    x = jax.random.normal(kx, (B, C, N, 1), dtype=jnp.float32)
    w = jax.random.normal(kw, (B, N), dtype=jnp.float32)

    # deterministic synthetic parameters (Conv2d(C, C, 1x1) + BatchNorm2d(C))
    conv_w = jax.random.normal(kcw, (C, C, 1, 1), dtype=jnp.float32) * 0.1
    conv_b = jax.random.normal(kcb, (C,), dtype=jnp.float32) * 0.1
    bn_gamma = 1.0 + 0.1 * jax.random.normal(kg, (C,), dtype=jnp.float32)
    bn_beta = 0.1 * jax.random.normal(kb, (C,), dtype=jnp.float32)
    bn_mean = 0.1 * jax.random.normal(km, (C,), dtype=jnp.float32)
    bn_var = jnp.abs(jax.random.normal(kv, (C,), dtype=jnp.float32)) + 0.5

    out = gs_forward(x, w, conv_w, conv_b, bn_gamma, bn_beta, bn_mean, bn_var)
    out = jax.block_until_ready(out)

    ref = gs_reference(x, w, conv_w, conv_b, bn_gamma, bn_beta, bn_mean, bn_var)
    assert out.shape == (B, C, N, 1)
    # bf16 streaming / bf16 MXU operands → loosened tolerance vs the f32 reference.
    assert jnp.allclose(out, ref, rtol=5e-2, atol=5e-2), "mismatch vs reference"

    print("KERNEL_OK")
</pallas_src>

<mosaic_0001>
module attributes {stable_mosaic.version = 11 : i64} {
  func.func @gs_kernel(%arg0: i32, %arg1: memref<1x1x256xf32, #tpu.memory_space<vmem>>, %arg2: memref<1x32x256xbf16, #tpu.memory_space<vmem>>, %arg3: memref<32x32xf32, #tpu.memory_space<vmem>>, %arg4: memref<32x1xf32, #tpu.memory_space<vmem>>, %arg5: memref<1x32x256xbf16, #tpu.memory_space<vmem>>) attributes {dimension_semantics = [#tpu.dimension_semantics<parallel>], iteration_bounds = array<i64: 2>, scalar_prefetch = 0 : i64, scratch_operands = 0 : i64, tpu.core_type = #tpu.core_type<tc>, window_params = [{transform_indices = @transform_0, window_bounds = array<i64: 1, 1, 256>}, {transform_indices = @transform_1, window_bounds = array<i64: 1, 32, 256>}, {pipeline_mode = #tpu.pipeline_mode<synchronous>, transform_indices = @transform_2, window_bounds = array<i64: 32, 32>}, {pipeline_mode = #tpu.pipeline_mode<synchronous>, transform_indices = @transform_3, window_bounds = array<i64: 32, 1>}, {transform_indices = @transform_4, window_bounds = array<i64: 1, 32, 256>}]} {
    %c0 = arith.constant 0 : index
    %c0_0 = arith.constant 0 : index
    %c0_1 = arith.constant 0 : index
    %0 = vector.load %arg1[%c0, %c0_0, %c0_1] : memref<1x1x256xf32, #tpu.memory_space<vmem>>, vector<1x1x256xf32>
    %1 = math.tanh %0 : vector<1x1x256xf32>
    %cst = arith.constant 0.000000e+00 : f32
    %2 = vector.broadcast %cst : f32 to vector<1x1x256xf32>
    %3 = arith.maximumf %1, %2 : vector<1x1x256xf32>
    %cst_2 = arith.constant dense<0.000000e+00> : vector<1x1xf32>
    %4 = vector.multi_reduction <add>, %3, %cst_2 [2] : vector<1x1x256xf32> to vector<1x1xf32>
    %5 = vector.shape_cast %4 : vector<1x1xf32> to vector<1x1x1xf32>
    %6 = vector.broadcast %5 : vector<1x1x1xf32> to vector<1x1x256xf32>
    %7 = arith.mulf %3, %6 : vector<1x1x256xf32>
    %cst_3 = arith.constant 1.000000e+00 : f32
    %8 = vector.broadcast %cst_3 : f32 to vector<1x1x256xf32>
    %9 = arith.addf %7, %8 : vector<1x1x256xf32>
    %10 = math.rsqrt %9 : vector<1x1x256xf32>
    %11 = arith.mulf %10, %10 : vector<1x1x256xf32>
    %12 = arith.mulf %3, %10 : vector<1x1x256xf32>
    %c0_4 = arith.constant 0 : index
    %c0_5 = arith.constant 0 : index
    %c0_6 = arith.constant 0 : index
    %13 = vector.load %arg2[%c0_4, %c0_5, %c0_6] : memref<1x32x256xbf16, #tpu.memory_space<vmem>>, vector<1x32x256xbf16>
    %14 = arith.extf %13 : vector<1x32x256xbf16> to vector<1x32x256xf32>
    %15 = vector.broadcast %11 : vector<1x1x256xf32> to vector<1x32x256xf32>
    %16 = arith.mulf %14, %15 : vector<1x32x256xf32>
    %17 = arith.truncf %16 : vector<1x32x256xf32> to vector<1x32x256xbf16>
    %18 = vector.broadcast %12 : vector<1x1x256xf32> to vector<1x32x256xf32>
    %19 = arith.mulf %14, %18 : vector<1x32x256xf32>
    %cst_7 = arith.constant dense<0.000000e+00> : vector<1x32xf32>
    %20 = vector.multi_reduction <add>, %19, %cst_7 [2] : vector<1x32x256xf32> to vector<1x32xf32>
    %21 = vector.shape_cast %20 : vector<1x32xf32> to vector<1x32x1xf32>
    %c0_8 = arith.constant 0 : index
    %c0_9 = arith.constant 0 : index
    %22 = vector.load %arg3[%c0_8, %c0_9] : memref<32x32xf32, #tpu.memory_space<vmem>>, vector<32x32xf32>
    %23 = arith.truncf %22 : vector<32x32xf32> to vector<32x32xbf16>
    %c0_10 = arith.constant 0 : index
    %c0_11 = arith.constant 0 : index
    %24 = vector.load %arg4[%c0_10, %c0_11] : memref<32x1xf32, #tpu.memory_space<vmem>>, vector<32x1xf32>
    %25 = vector.shape_cast %17 : vector<1x32x256xbf16> to vector<32x256xbf16>
    %cst_12 = arith.constant dense<0.000000e+00> : vector<32x256xf32>
    %26 = tpu.matmul %23, %25, %cst_12 {dimension_numbers = #tpu.dot_dimension_numbers<[1], [0], [0], [1], [0, 0, 1, 1], [], []>} : vector<32x32xbf16>, vector<32x256xbf16>, vector<32x256xf32> -> vector<32x256xf32>
    %27 = vector.shape_cast %21 : vector<1x32x1xf32> to vector<32x1xf32>
    %cst_13 = arith.constant dense<0.000000e+00> : vector<32x1xf32>
    %28 = tpu.matmul %22, %27, %cst_13 {dimension_numbers = #tpu.dot_dimension_numbers<[1], [0], [0], [1], [0, 0, 1, 1], [], []>} : vector<32x32xf32>, vector<32x1xf32>, vector<32x1xf32> -> vector<32x1xf32>
    %29 = vector.shape_cast %12 : vector<1x1x256xf32> to vector<1x256xf32>
    %30 = vector.broadcast %28 : vector<32x1xf32> to vector<32x256xf32>
    %31 = vector.broadcast %29 : vector<1x256xf32> to vector<32x256xf32>
    %32 = arith.mulf %30, %31 : vector<32x256xf32>
    %33 = arith.addf %26, %32 : vector<32x256xf32>
    %34 = vector.broadcast %24 : vector<32x1xf32> to vector<32x256xf32>
    %35 = arith.addf %33, %34 : vector<32x256xf32>
    %cst_14 = arith.constant 0.000000e+00 : f32
    %36 = vector.broadcast %cst_14 : f32 to vector<32x256xf32>
    %37 = arith.maximumf %35, %36 : vector<32x256xf32>
    %38 = vector.shape_cast %14 : vector<1x32x256xf32> to vector<32x256xf32>
    %39 = arith.addf %38, %37 : vector<32x256xf32>
    %40 = arith.truncf %39 : vector<32x256xf32> to vector<32x256xbf16>
    %c0_15 = arith.constant 0 : index
    %c0_16 = arith.constant 0 : index
    %c0_17 = arith.constant 0 : index
    %41 = vector.load %arg5[%c0_15, %c0_16, %c0_17] : memref<1x32x256xbf16, #tpu.memory_space<vmem>>, vector<1x32x256xbf16>
    %42 = vector.shape_cast %41 : vector<1x32x256xbf16> to vector<32x256xbf16>
    %43 = vector.shape_cast %40 : vector<32x256xbf16> to vector<1x32x256xbf16>
    tpu.vector_store %arg5[%c0_15, %c0_16, %c0_17], %43 {strides = array<i32>} : memref<1x32x256xbf16, #tpu.memory_space<vmem>>, vector<1x32x256xbf16>,
    return
  }
  func.func @transform_0(%arg0: i32) -> (i32, i32, i32) {
    %c0_i32 = arith.constant 0 : i32
    %c0_i32_0 = arith.constant 0 : i32
    %c0_i32_1 = arith.constant 0 : i32
    return %arg0, %c0_i32, %c0_i32_0 : i32, i32, i32
  }
  func.func @transform_1(%arg0: i32) -> (i32, i32, i32) {
    %c0_i32 = arith.constant 0 : i32
    %c0_i32_0 = arith.constant 0 : i32
    %c0_i32_1 = arith.constant 0 : i32
    return %arg0, %c0_i32, %c0_i32_0 : i32, i32, i32
  }
  func.func @transform_2(%arg0: i32) -> (i32, i32) {
    %c0_i32 = arith.constant 0 : i32
    %c0_i32_0 = arith.constant 0 : i32
    %c0_i32_1 = arith.constant 0 : i32
    return %c0_i32, %c0_i32_0 : i32, i32
  }
  func.func @transform_3(%arg0: i32) -> (i32, i32) {
    %c0_i32 = arith.constant 0 : i32
    %c0_i32_0 = arith.constant 0 : i32
    %c0_i32_1 = arith.constant 0 : i32
    return %c0_i32, %c0_i32_0 : i32, i32
  }
  func.func @transform_4(%arg0: i32) -> (i32, i32, i32) {
    %c0_i32 = arith.constant 0 : i32
    %c0_i32_0 = arith.constant 0 : i32
    %c0_i32_1 = arith.constant 0 : i32
    return %arg0, %c0_i32, %c0_i32_0 : i32, i32, i32
  }
}

</mosaic_0001>

<bundles_post_ra>
// kernel: tpu_custom_call.1
= control target key start
LH: loop header
LB: loop body
LE: loop exit
PB: predicated region body
PF: predicated region fallthrough
CT: control target
= control target key end

     0   :  { %9 = vsyncpa [#allocation3], 0  ;;  %s1206_s0 = inlined_call_operand.vmem [shape: f32[2,1,256], index: 0, kind: input, shape index: {}]   ;;  %s1207_s1 = inlined_call_operand.hbm [shape: bf16[2,32,256], index: 1, kind: input, shape index: {}]   ;;  %s1208_s2 = inlined_call_operand.vmem [shape: f32[32,32], index: 2, kind: input, shape index: {}]   ;;  %s1209_s3 = inlined_call_operand.vmem [shape: f32[32,1], index: 3, kind: input, shape index: {}]   ;;  %s1210_s4 = inlined_call_operand.hbm [shape: bf16[2,32,256], index: 4, kind: output, shape index: {}]  }
   0x1   :  { %11 = vsyncpa [#allocation3 + $0x1], 0 }
   0x2   :  { %12 = vsyncpa [#allocation4], 0 }
   0x3   :  { %14 = vsyncpa [#allocation4 + $0x1], 0  ;;  %s945_s15 = smov 0   ;;  %s947_s16 = smov 0  }
   0x4   :  { %s949_s17 = smov 0   ;;  %s951_s18 = smov 0  }
   0x5 LB: > { %s966_s19 = sadd.s32 4294967295, %s911_s18   ;;  %s697_s20 = sadd.s32 4294967294, %s911_s18   ;;  %s911_s18 = sphi %s951_s18, %s1223_s18   ;;  %s907_s17 = sphi %s949_s17, %s1222_s17   ;;  %s903_s16 = sphi %s947_s16, %s1221_s16   ;;  %s899_s15 = sphi %s945_s15, %s1220_s15  }
   0x6   : > { %s970_s21 = sadd.s32 1, %s911_s18   ;;  %s53_s22 = sadd.s32 1, %s907_s17 }
   0x7   : > { %s50_s23 = ssub.s32 %s911_s18, %s970_s21  ;;  %p60_p0 = scmp.ne.s32.totalorder %s907_s17, %s903_s16 }
   0x8   : > { %p51_p1 = scmp.eq.s32.totalorder %s50_s23, 0  ;;  %p61_p2 = scmp.eq.s32.totalorder %s911_s18, 0 }
   0x9   : > { %p66_p3 = scmp.ne.s32.totalorder %s903_s16, %s899_s15  ;;  %p67_p4 = scmp.eq.s32.totalorder %s966_s19, 0 }
   0xa   : > { %s982_s24 = scalar_select %p51_p1, %s907_s17, %s53_s22  }
   0xb   : > { %p984_p5 = por %p61_p2, %p60_p0  ;;  %p988_p6 = por %p67_p4, %p66_p3 }
   0xc   : > { %p132_p7 = scmp.eq.s32.totalorder %s966_s19, 1  ;;  %p138_p8 = scmp.eq.s32.totalorder %s697_s20, 1 }
   0xd   : > { %p770_p10 = scmp.lt.s32.totalorder %s911_s18, 2  ;;  %s171_s29 = sand.u32 1, %s907_s17  }
   0xe   : > { %p995_p11 = por %p132_p7, %p60_p0  ;;  %p999_p12 = por %p138_p8, %p66_p3 }
   0xf   : > { %s722_s30 = sshll.u32 %s911_s18, 9  ;;  %s700_s5 = sshll.u32 %s171_s29, 5 }
  0x10   : > { %s1214_s27 = scalar_select %p995_p11, 1, 0 }
  0x11   : > { %s1215_s28 = scalar_select %p999_p12, 1, 0 }
  0x12   : > { %s1008_s8 = scalar_lea.hbm %s1207_s1, %s722_s30  ;;  %s175_s9 = scalar_lea.vmem [#allocation2], %s700_s5 }
  0x13   : > { %s182_s10 = sshll.u32 %s175_s9, 4  ;;  %p1012_p13 = pnand %p770_p10, %p984_p5  ;;  %s1016_s10 = int_to_ptr.vmem [resolvable:$true] %s182_s10 }
  0x14   : > { %s1018_s12 = scalar_lea.sflag [#allocation3], %s171_s29  ;;  %s815_s13 = scalar_lea.hbm %s1008_s8, 512 }
  0x15   : > { %p816_p0 = scmp.ne.s32.totalorder %s1008_s8, %s815_s13  ;;  %p817_p1 = pneg %p1012_p13 }
  0x16   : > { %s820_s22 = scalar_lea.hbm %s1207_s1, 1024  ;;  %p821_p4 = scmp.lt.u32.totalorder %s1008_s8, %s1207_s1 }
  0x17   : > { %p818_p2 = pnand %p817_p1, %p816_p0  ;;  %p822_p5 = scmp.lt.u32.totalorder %s820_s22, %s815_s13 }
  0x18   : > { %p824_p8 = scmp.lt.u32.totalorder %s815_s13, %s1008_s8 }
  0x19   : > { %p819_p3 = pneg %p818_p2  ;;  %p823_p7 = por %p822_p5, %p821_p4 }
  0x1b   : > { %p825_p10 = por %p824_p8, %p823_p7 }
  0x1d   : > { %p826_p9 = pnand %p825_p10, %p819_p3 }
  0x1f   : > { %829 = shalt.err (!%p826_p9)
}
  0x20   : > { %s830_s29 = scalar_lea.vmem %s1016_s10, 512  ;;  %s913_s30 = smov [#allocation2]  }
  0x21   : > { %p831_p0 = scmp.ne.s32.totalorder %s1016_s10, %s830_s29  ;;  %s835_s5 = sshll.u32 %s913_s30, 4  ;;  %s836_s5 = int_to_ptr.vmem [resolvable:$false] %s835_s5 }
  0x22   : > { %s837_s6 = scalar_lea.vmem %s836_s5, 1024  ;;  %p838_p11 = scmp.lt.s32.totalorder %s1016_s10, %s836_s5 }
  0x23   : > { %p833_p2 = pnand %p831_p0, %p817_p1  ;;  %p839_p4 = scmp.lt.s32.totalorder %s837_s6, %s830_s29 }
  0x25   : > { %p834_p12 = pneg %p833_p2  ;;  %p840_p5 = por %p839_p4, %p838_p11 }
  0x27   : > { %p841_p7 = pnand %p840_p5, %p834_p12 }
  0x29   : > { %844 = shalt.err (!%p841_p7)
}
  0x2a   : > { %s914_s7 = smov 128   ;;  %s915_s9 = smov 8  }
  0x2b   : > { %765 = dma.hbm_to_vmem [thread:$0]  (!%p1012_p13), %s1008_s8, 512, %s1016_s10, %s1018_s12, %s914_s7, %s914_s7, %s915_s9  }
  0x2c   : > { %p703_p9 = scmp.ge.s32.totalorder %s911_s18, 1  ;;  %p190_p1 = scmp.lt.s32.totalorder %s911_s18, 3 }
  0x2e   : > { %p191_p3 = pnand %p703_p9, %p190_p1 }
  0x2f   : > { %s1049_s13 = sand.u32 (!%p191_p3), 1, %s903_s16  }
  0x30   : > { %194 = sbr.rel (%p191_p3) target bundleno = 776 (0x308), region = 36  ;;  %s704_s14 = sshll.u32 (!%p191_p3), %s1049_s13, 5 }
  0x31   : > { %s197_s20 = scalar_lea.sflag (!%p191_p3), [#allocation3], %s1049_s13  ;;  %s200_s22 = scalar_lea.vmem (!%p191_p3), [#allocation2], %s704_s14 }
  0x37   : > { %890 = dma.done.wait (%p988_p6), %s197_s20, 512  }
  0x38   : > { %892 = vsyncadd (%p988_p6), %s197_s20, 4294966784  ;;  %p229_p11 = scmp.lt.s32.totalorder %s966_s19, 1  ;;  %v238_v1 = vlaneseq  ;;  %vm248_vm0 = vcmask 1040384   ;;  %v266_v16 = vld [vmem:[%s200_s22 + $0x8] sm:$0xff]  ;;  %v265_v17 = vld [vmem:[%s200_s22] sm:$0xff]  ;;  %vm341_vm1 = vcmask 261120  }
  0x39   : > { %v267_v18 = vld [vmem:[%s200_s22 + $0x10] sm:$0xff]  ;;  %v268_v19 = vld [vmem:[%s200_s22 + $0x18] sm:$0xff]  ;;  %v1064_v21 = vunpack.c.l.bf16 %v266_v16  ;;  %v1066_v22 = vunpack.c.h.bf16 %v266_v16  ;;  %v1068_v24 = vunpack.c.l.bf16 %v265_v17  ;;  %v1070_v25 = vunpack.c.h.bf16 %v265_v17  ;;  %v331_v59 = vld [vmem:[%s1208_s2] sm:$0xff]  ;;  %s228_s25 = scalar_lea.vmem [#allocation5], %s704_s14  ;;  %s727_s30 = sshll.u32 %s966_s19, 9 }
  0x3a   : > { %s230_s8 = scalar_select %p229_p11, %s966_s19, 1  ;;  %v239_v2 = vshrl.u32 %v238_v1, 7  ;;  %v1072_v27 = vunpack.c.h.bf16 %v267_v18  ;;  %v1074_v28 = vunpack.c.h.bf16 %v268_v19  ;;  %v1080_v33 = vunpack.c.l.bf16 %v267_v18  ;;  %744 = vmatprep.mubr.msk.f32.mxu0 %vm341_vm1, %v331_v59  ;;  %v332_v60 = vld [vmem:[%s1208_s2 + $0x8] sm:$0xff]  ;;  %v337_v62 = vld [vmem:[%s1209_s3] sm:$0xff]  ;;  %v333_v1 = vld [vmem:[%s1208_s2 + $0x10] sm:$0xff] }
  0x3b   : > { %v1082_v34 = vunpack.c.l.bf16 %v268_v19  ;;  %v335_v61 = vpack.c.bf16 %v332_v60, %v331_v59  ;;  %v916_v63 = vmov 0   ;;  %s612_s29 = sshll.u32 %s228_s25, 4  ;;  %s1162_s6 = scalar_lea.hbm %s1210_s4, %s727_s30  ;;  %s1153_s29 = int_to_ptr.vmem [resolvable:$true] %s612_s29 }
  0x3c   : > { %s706_s10 = sshll.u32 %s230_s8, 1  ;;  %v240_v3 = vsub.s32 0, %v239_v2  ;;  %v244_v4 = vsub.s32 1, %v239_v2  ;;  %505 = vmatprep.mubr.bf16.mxu1 %v916_v63  ;;  %810 = vset.pattern.permute.xlu1 %v916_v63  ;;  %v334_v2 = vld [vmem:[%s1208_s2 + $0x18] sm:$0xff]  ;;  %s599_s19 = scalar_lea.sflag [#allocation4], %s1049_s13 }
  0x3d   : > { %s232_s23 = scalar_lea.vmem %s1206_s0, %s706_s10  ;;  %809 = vset.pattern.permute.xlu0 %v916_v63  ;;  %s845_s7 = scalar_lea.vmem %s1153_s29, 512 }
  0x3e   : > { %v234_v0 = vld [vmem:[%s232_s23] sm:$0x3]  ;;  %p846_p6 = scmp.ne.s32.totalorder %s1153_s29, %s845_s7  ;;  %p1217_p12 = scmp.ne.s32.totalorder %s1214_s27, 0 }
  0x3f   : > { %811 = vtanh.f32 %v234_v0  ;;  %v338_v0 = vld [vmem:[%s1209_s3 + $0x8] sm:$0xff]  ;;  %s917_s9 = smov [#allocation5]  }
  0x40   : > { %p847_p13 = pnand %p846_p6, %p1217_p12  ;;  %s849_s20 = sshll.u32 %s917_s9, 4  ;;  %s850_s20 = int_to_ptr.vmem [resolvable:$false] %s849_s20 }
  0x41   : > { %s851_s22 = scalar_lea.vmem %s850_s20, 1024  ;;  %p852_p10 = scmp.lt.s32.totalorder %s1153_s29, %s850_s20 }
  0x42   : > { %p848_p8 = pneg %p847_p13  ;;  %p853_p0 = scmp.lt.s32.totalorder %s851_s22, %s845_s7 }
  0x44   : > { %p854_p2 = por %p853_p0, %p852_p10 }
  0x46   : > { %p855_p4 = pnand %p854_p2, %p848_p8 }
  0x49   : > { %v812_v5 = vpop.eup %811 }
  0x4a   : > { %v236_v6 = vmax.f32 %v812_v5, 0.0 }
  0x4c   : > { %v241_v7 = vrot.slane %v236_v6, %v240_v3  ;;  %v245_v8 = vrot.slane %v236_v6, %v244_v4 }
  0x4e   : > { %v249_v9 = vsel %vm248_vm0, %v241_v7, 0.0  ;;  %v250_v10 = vsel %vm248_vm0, %v245_v8, 0.0 }
  0x4f   : > { %v251_v11 = vadd.f32 %v250_v10, %v249_v9 }
  0x51   : > { %252 = vadd.xlane.f32.xlu0 %v251_v11 }
  0xde   : > { %v253_v12 = vpop.xlane.xlu0 %252 }
  0xdf   : > { %v258_v13 = vrot.slane %v253_v12, %v240_v3 }
  0xe1   : > { %v260_v14 = vmul.f32 %v258_v13, %v236_v6 }
  0xe3   : > { %v261_v15 = vadd.f32 1.0, %v260_v14 }
  0xe5   : > { %813 = vrsqrt.f32 %v261_v15 }
  0xef   : > { %v814_v20 = vpop.eup %813 }
  0xf0   : > { %v264_v23 = vmul.f32 %v814_v20, %v236_v6  ;;  %v263_v26 = vmul.f32 %v814_v20, %v814_v20 }
  0xf2   : > { %v1076_v29 = vrot.slane %v264_v23, %v240_v3  ;;  %v1078_v30 = vrot.slane %v264_v23, %v244_v4  ;;  %v285_v31 = vrot.slane %v263_v26, %v244_v4  ;;  %v281_v32 = vrot.slane %v263_v26, %v240_v3  ;;  %v339_v4 = vld [vmem:[%s1209_s3 + $0x10] sm:$0xff]  ;;  %v340_v23 = vld [vmem:[%s1209_s3 + $0x18] sm:$0xff] }
  0xf3   : > { %v336_v3 = vpack.c.bf16 %v334_v2, %v333_v1 }
  0xf4   : > { %v313_v35 = vmul.f32 %v1076_v29, %v1064_v21  ;;  %v314_v36 = vmul.f32 %v1078_v30, %v1066_v22  ;;  %v311_v37 = vmul.f32 %v1076_v29, %v1068_v24  ;;  %v312_v38 = vmul.f32 %v1078_v30, %v1070_v25 }
  0xf5   : > { %v289_v39 = vmul.f32 %v285_v31, %v1070_v25  ;;  %v291_v40 = vmul.f32 %v285_v31, %v1066_v22  ;;  %v288_v41 = vmul.f32 %v281_v32, %v1068_v24  ;;  %v290_v42 = vmul.f32 %v281_v32, %v1064_v21 }
  0xf6   : > { %v322_v43 = vadd.f32 %v314_v36, %v313_v35  ;;  %v319_v44 = vadd.f32 %v312_v38, %v311_v37  ;;  %v293_v45 = vmul.f32 %v285_v31, %v1072_v27  ;;  %v295_v46 = vmul.f32 %v285_v31, %v1074_v28 }
  0xf7   : > { %v297_v47 = vpack.c.bf16 %v291_v40, %v289_v39  ;;  %v296_v48 = vpack.c.bf16 %v290_v42, %v288_v41  ;;  %v315_v49 = vmul.f32 %v1076_v29, %v1080_v33  ;;  %v316_v50 = vmul.f32 %v1078_v30, %v1072_v27 }
  0xf8   : > { %323 = vadd.xlane.f32.xlu1 %v322_v43  ;;  %320 = vadd.xlane.f32.xlu0 %v319_v44  ;;  %v317_v51 = vmul.f32 %v1076_v29, %v1082_v34  ;;  %v318_v52 = vmul.f32 %v1078_v30, %v1074_v28  ;;  %v299_v53 = vpack.c.bf16 %v295_v46, %v293_v45 }
  0xf9   : > { %473 = vmatprep.subr.bf16.mxu1 %v297_v47  ;;  %v292_v54 = vmul.f32 %v281_v32, %v1080_v33  ;;  %v294_v55 = vmul.f32 %v281_v32, %v1082_v34  ;;  %v325_v56 = vadd.f32 %v316_v50, %v315_v49 }
  0xfa   : > { %474 = vmatpush1.bf16.msra.mxu1 %v296_v48  ;;  %v328_v57 = vadd.f32 %v318_v52, %v317_v51 }
  0xfb   : > { %475 = vmatprep.subr.bf16.mxu1 %v299_v53  ;;  %v298_v58 = vpack.c.bf16 %v294_v55, %v292_v54 }
  0xfc   : > { %326 = vadd.xlane.f32.xlu1 %v325_v56  ;;  %329 = vadd.xlane.f32.xlu0 %v328_v57 }
  0xfe   : > { %476 = vmatpush1.bf16.msra.mxu1 %v298_v58 }
 0x101   : > { %711 = vmatmul.mubr.msk.bf16.vlgmr.msra.gmra.mrb[0].mxu1 %vm341_vm1, %v335_v61 }
 0x102   : > { %515 = vmatprep.mubr.bf16.mxu1 %v916_v63 }
 0x109   : > { %712 = vmatmul.mubr.msk.bf16.gmra.mrb[4].mxu1 %vm341_vm1, %v336_v3 }
 0x10d   : > { %528 = vperm.xlu1 %810, %v337_v62  }
 0x111   : > { %533 = vperm.xlu1 %810, %v338_v0  }
 0x115   : > { %538 = vperm.xlu1 %810, %v339_v4  }
 0x185   : > { %v324_v5 = vpop.xlane.xlu1 %323  ;;  %v321_v6 = vpop.xlane.xlu0 %320 }
 0x186   : > { %v750_v7 = vpack.c.bf16 %v324_v5, %v321_v6 }
 0x188   : > { %751 = vmatprep.subr.bf16.mxu0 %v750_v7 }
 0x189   : > { %v327_v8 = vpop.xlane.xlu1 %326  ;;  %753 = vmatpush3.bf16.msra.mxu0 %v750_v7  ;;  %v330_v9 = vpop.xlane.xlu0 %329 }
 0x18a   : > { %v754_v10 = vpack.c.bf16 %v330_v9, %v327_v8 }
 0x18c   : > { %755 = vmatprep.subr.bf16.mxu0 %v754_v10 }
 0x18d   : > { %757 = vmatpush3.bf16.msra.mxu0 %v754_v10  ;;  %v529_v32 = vpop.permute.xlu1 %528 }
 0x190   : > { %745 = vmatmul.mubr.msk.f32.vlgmr.msra.gmra.mrb[0].mxu0 %vm341_vm1, %v332_v60 }
 0x191   : > { %747 = vmatprep.mubr.msk.f32.mxu0 %vm341_vm1, %v333_v1  ;;  %v534_v35 = vpop.permute.xlu1 %533 }
 0x194   : > { %748 = vmatmul.mubr.msk.f32.gmra.mrb[2].mxu0 %vm341_vm1, %v334_v2 }
 0x195   : > { %v539_v36 = vpop.permute.xlu1 %538 }
 0x1d4   : > { %v507_v11 = vpop.f32.mrb[0].mxu1 }
 0x1d5   : > { %v509_v12 = vpop.f32.mrb[1].mxu1 }
 0x1d6   : > { %v511_v13 = vpop.f32.mrb[2].mxu1 }
 0x1d7   : > { %v513_v18 = vpop.f32.mrb[3].mxu1 }
 0x1dc   : > { %v517_v19 = vpop.f32.mrb[4].mxu1 }
 0x1dd   : > { %v519_v20 = vpop.f32.mrb[5].mxu1 }
 0x1de   : > { %v521_v26 = vpop.f32.mrb[6].mxu1 }
 0x1df   : > { %v523_v31 = vpop.f32.mrb[7].mxu1 }
 0x263   : > { %v746_v14 = vpop.f32.mrb[0].mxu0 }
 0x264   : > { %446 = vperm.xlu0 %809, %v746_v14   ;;  %v420_v15 = vpop.f32.mrb[1].mxu0 }
 0x265   : > { %441 = vperm.xlu1 %810, %v420_v15  }
 0x267   : > { %v749_v16 = vpop.f32.mrb[2].mxu0 }
 0x268   : > { %v430_v17 = vpop.f32.mrb[3].mxu0 }
 0x269   : > { %456 = vperm.xlu1 %810, %v749_v16  }
 0x26d   : > { %451 = vperm.xlu1 %810, %v430_v17  }
 0x271   : > { %543 = vperm.xlu1 %810, %v340_v23  }
 0x2e3   : > { %v447_v37 = vpop.permute.xlu0 %446 }
 0x2e4   : > { %v461_v38 = vmul.f32 %v447_v37, %v1076_v29  ;;  %v462_v39 = vmul.f32 %v447_v37, %v1078_v30  ;;  %v442_v40 = vpop.permute.xlu1 %441 }
 0x2e5   : > { %v459_v41 = vmul.f32 %v442_v40, %v1076_v29  ;;  %v460_v42 = vmul.f32 %v442_v40, %v1078_v30 }
 0x2e6   : > { %v512_v43 = vadd.f32 %v511_v13, %v461_v38  ;;  %v514_v44 = vadd.f32 %v513_v18, %v462_v39 }
 0x2e7   : > { %v508_v45 = vadd.f32 %v507_v11, %v459_v41  ;;  %v510_v46 = vadd.f32 %v509_v12, %v460_v42 }
 0x2e8   : > { %v548_v47 = vadd.f32 %v534_v35, %v512_v43  ;;  %v549_v48 = vadd.f32 %v534_v35, %v514_v44  ;;  %v457_v49 = vpop.permute.xlu1 %456 }
 0x2e9   : > { %v546_v50 = vadd.f32 %v529_v32, %v508_v45  ;;  %v547_v51 = vadd.f32 %v529_v32, %v510_v46  ;;  %v465_v54 = vmul.f32 %v457_v49, %v1076_v29  ;;  %v466_v57 = vmul.f32 %v457_v49, %v1078_v30 }
 0x2ea   : > { %v556_v52 = vmax.f32 %v548_v47, 0.0  ;;  %v557_v53 = vmax.f32 %v549_v48, 0.0 }
 0x2eb   : > { %v554_v55 = vmax.f32 %v546_v50, 0.0  ;;  %v555_v56 = vmax.f32 %v547_v51, 0.0  ;;  %v522_v2 = vadd.f32 %v521_v26, %v465_v54  ;;  %v524_v4 = vadd.f32 %v523_v31, %v466_v57 }
 0x2ec   : > { %v564_v58 = vadd.f32 %v556_v52, %v1064_v21  ;;  %v565_v59 = vadd.f32 %v557_v53, %v1066_v22  ;;  %v452_v60 = vpop.permute.xlu1 %451 }
 0x2ed   : > { %v562_v61 = vadd.f32 %v554_v55, %v1068_v24  ;;  %v563_v62 = vadd.f32 %v555_v56, %v1070_v25  ;;  %v463_v63 = vmul.f32 %v452_v60, %v1076_v29  ;;  %v464_v0 = vmul.f32 %v452_v60, %v1078_v30 }
 0x2ee   : > { %v724_v1 = vpack.c.bf16 %v565_v59, %v564_v58 }
 0x2ef   : > { %v723_v3 = vpack.c.bf16 %v563_v62, %v562_v61  ;;  %v518_v5 = vadd.f32 %v517_v19, %v463_v63  ;;  %v520_v6 = vadd.f32 %v519_v20, %v464_v0 }
 0x2f0   : > { %595 = vst [vmem:[%s228_s25 + $0x8] sm:$0xff] %v724_v1  ;;  %v544_v21 = vpop.permute.xlu1 %543 }
 0x2f1   : > { %594 = vst [vmem:[%s228_s25] sm:$0xff] %v723_v3  ;;  %v550_v22 = vadd.f32 %v539_v36, %v518_v5  ;;  %v551_v24 = vadd.f32 %v539_v36, %v520_v6  ;;  %v552_v7 = vadd.f32 %v544_v21, %v522_v2  ;;  %v553_v25 = vadd.f32 %v544_v21, %v524_v4 }
 0x2f3   : > { %v558_v29 = vmax.f32 %v550_v22, 0.0  ;;  %v559_v30 = vmax.f32 %v551_v24, 0.0  ;;  %v560_v8 = vmax.f32 %v552_v7, 0.0  ;;  %v561_v9 = vmax.f32 %v553_v25, 0.0 }
 0x2f5   : > { %v566_v10 = vadd.f32 %v558_v29, %v1080_v33  ;;  %v567_v11 = vadd.f32 %v559_v30, %v1072_v27  ;;  %v568_v12 = vadd.f32 %v560_v8, %v1082_v34  ;;  %v569_v13 = vadd.f32 %v561_v9, %v1074_v28 }
 0x2f7   : > { %v725_v14 = vpack.c.bf16 %v567_v11, %v566_v10  ;;  %v726_v15 = vpack.c.bf16 %v569_v13, %v568_v12 }
 0x2f9   : > { %596 = vst [vmem:[%s228_s25 + $0x10] sm:$0xff] %v725_v14  ;;  %597 = vst [vmem:[%s228_s25 + $0x18] sm:$0xff] %v726_v15 }
 0x2fa   : > { %858 = shalt.err (!%p855_p4)
}
 0x2fb   : > { %s859_s8 = scalar_lea.hbm %s1162_s6, 512  ;;  %s863_s12 = scalar_lea.hbm %s1210_s4, 1024 }
 0x2fc   : > { %p860_p5 = scmp.ne.s32.totalorder %s1162_s6, %s859_s8  ;;  %p864_p1 = scmp.lt.u32.totalorder %s1162_s6, %s1210_s4 }
 0x2fd   : > { %p865_p3 = scmp.lt.u32.totalorder %s863_s12, %s859_s8  ;;  %p867_p6 = scmp.lt.u32.totalorder %s859_s8, %s1162_s6 }
 0x2fe   : > { %p861_p7 = pnand %p860_p5, %p1217_p12 }
 0x2ff   : > { %p866_p11 = por %p865_p3, %p864_p1 }
 0x300   : > { %p862_p9 = pneg %p861_p7 }
 0x301   : > { %p868_p13 = por %p867_p6, %p866_p11 }
 0x303   : > { %p869_p8 = pnand %p868_p13, %p862_p9 }
 0x305   : > { %872 = shalt.err (!%p869_p8)
}
 0x306   : > { %s918_s25 = smov 128   ;;  %s919_s30 = smov 8  }
 0x307   : > { %760 = dma.vmem_to_hbm [thread:$0]  (%p1217_p12), %s1153_s29, 512, %s1162_s6, %s599_s19, %s918_s25, %s918_s25, %s919_s30  }
 0x308 PF: > { %s627_s14 = sand.u32 1, %s899_s15   ;;  %p1218_p10 = scmp.ne.s32.totalorder %s1215_s28, 0 }
 0x309   : > { %p1219_p0 = scmp.ge.s32.totalorder %s911_s18, 2  ;;  %s628_s5 = scalar_lea.sflag [#allocation4], %s627_s14 }
 0x30b   : > { %p767_p2 = pnand %p1219_p0, %p1218_p10 }
 0x30d   : > { %894 = dma.done.wait (!%p767_p2), %s628_s5, 512  }
 0x30e   : > { %896 = vsyncadd (!%p767_p2), %s628_s5, 4294966784  ;;  %p17_p4 = scmp.ge.s32.totalorder %s970_s21, 4   ;;  %s1220_s15 = smov %s903_s16 }
 0x30f   : > { %s1221_s16 = smov %s907_s17  ;;  %s1222_s17 = smov %s982_s24 }
 0x310   : > { %s1223_s18 = smov %s970_s21  ;;  %19 = sbr.rel (!%p17_p4) target bundleno = 5 (0x5), region = 84 }
 0x317   :  { %633 = vsyncpa [#allocation3], 1 }
 0x318   :  { %635 = vsyncpa [#allocation3 + $0x1], 1 }
 0x319   :  { %636 = vsyncpa [#allocation4], 1 }
 0x31a   :  { %638 = vsyncpa [#allocation4 + $0x1], 1 }

</bundles_post_ra>
